<compile_context>
chip_gen: v7x
topology: tpu7x:2x2x1
jax: 0.10.0
libtpu: 0.0.40
codegen_flags: <defaults>
</compile_context>

<pallas_src>
import jax
import jax.numpy as jnp
from jax.experimental import pallas as pl
from jax.experimental.pallas import tpu as pltpu

SMOOTH = 1.0  # module default


def _cdiv(a, b):
    return -(-a // b)


def _round_up(a, b):
    return _cdiv(a, b) * b


def _soft_dice_kernel(x_ref, lbl_ref, dc_ref, acc_tp, acc_den):
    """x_ref: (1, C, T) activations, lbl_ref: (1, 1, T) int32 labels,
    dc_ref: (1, 1, C) per-(b, c) dice, acc_*: (1, C, T) f32 scratch."""
    s = pl.program_id(1)

    @pl.when(s == 0)
    def _init():
        acc_tp[...] = jnp.zeros_like(acc_tp)
        acc_den[...] = jnp.zeros_like(acc_den)

    x = x_ref[...].astype(jnp.float32)                      # (1, C, T)
    lbl = lbl_ref[...]                                      # (1, 1, T) int32
    ch = jax.lax.broadcasted_iota(jnp.int32, x.shape, 1)    # channel index
    mask = (ch == lbl).astype(jnp.float32)                  # one-hot, in VMEM

    # Elementwise (VPU) accumulation; no per-tile cross-lane reduce.
    acc_tp[...] += x * mask        # -> sum(x * y)
    acc_den[...] += x + mask       # -> sum(x) + sum(y) = 2*tp + fp + fn

    @pl.when(s == pl.num_programs(1) - 1)
    def _finalize():
        tp = jnp.sum(acc_tp[...], axis=-1)                  # (1, C)
        den = jnp.sum(acc_den[...], axis=-1)                # (1, C)
        dc = (2.0 * tp + SMOOTH) / (den + SMOOTH)
        dc_ref[...] = dc[:, None, :]                        # (1, 1, C)


def soft_dice_loss(x, y):
    """x: (B, C, H, W) net output (apply_nonlin=None -> used as-is).
       y: (B, H, W) or (B, 1, H, W) integer label map, or (B, C, H, W) one-hot."""
    B, C, H, W = x.shape
    HW = H * W

    if y.ndim == 4 and y.shape[1] == C and C > 1:
        # TODO(synk): soft (non one-hot) gt tensors are not supported by the
        # label-map fast path; hard one-hot is converted back to labels here.
        labels = jnp.argmax(y, axis=1).astype(jnp.int32)    # (B, H, W)
    elif y.ndim == 4:
        labels = y[:, 0].astype(jnp.int32)                  # (B, 1, H, W) map
    else:
        labels = y.astype(jnp.int32)                        # (B, H, W) map

    # --- spatial tile selection: ~2 MiB of f32 accumulator per step ----------
    max_tile_f32_bytes = 2 * 1024 * 1024
    t_max = max(128, (max_tile_f32_bytes // (4 * C)) // 128 * 128)
    hw128 = _round_up(HW, 128)
    n_tiles = _cdiv(hw128, t_max)
    T = _round_up(_cdiv(HW, n_tiles), 128)
    HWp = n_tiles * T

    xf = x.reshape(B, C, HW)
    lf = labels.reshape(B, 1, HW)
    if HWp != HW:
        # pad values are neutral: x=0 adds nothing to sums, label=-1 never
        # matches any channel index.
        xf = jnp.pad(xf, ((0, 0), (0, 0), (0, HWp - HW)))
        lf = jnp.pad(lf, ((0, 0), (0, 0), (0, HWp - HW)), constant_values=-1)

    x_itemsize = jnp.dtype(xf.dtype).itemsize
    cost = pl.CostEstimate(
        flops=6 * B * C * HWp,
        transcendentals=0,
        bytes_accessed=B * C * HWp * x_itemsize + B * HWp * 4 + B * C * 4,
    )

    dc = pl.pallas_call(
        _soft_dice_kernel,
        out_shape=jax.ShapeDtypeStruct((B, 1, C), jnp.float32),
        grid_spec=pltpu.PrefetchScalarGridSpec(
            num_scalar_prefetch=0,
            grid=(B, n_tiles),
            in_specs=[
                pl.BlockSpec((1, C, T), lambda b, s: (b, 0, s)),
                pl.BlockSpec((1, 1, T), lambda b, s: (b, 0, s)),
            ],
            out_specs=pl.BlockSpec((1, 1, C), lambda b, s: (b, 0, 0)),
            scratch_shapes=[
                pltpu.VMEM((1, C, T), jnp.float32),   # acc_tp
                pltpu.VMEM((1, C, T), jnp.float32),   # acc_den
            ],
        ),
        compiler_params=pltpu.CompilerParams(
            dimension_semantics=("parallel", "arbitrary")),
        cost_estimate=cost,
    )(xf, lf)

    # batch_dice=False, do_bg=True -> mean over (B, C); trivial (B*C scalars).
    return 1.0 - jnp.mean(dc)


def soft_dice_loss_ref(x, y):
    """Pure-JAX reference mirroring the PyTorch module (default args)."""
    B, C, H, W = x.shape
    if y.ndim == 3:
        y_onehot = jax.nn.one_hot(y, C, dtype=jnp.float32, axis=1)
    elif y.ndim == 4 and y.shape[1] == 1:
        y_onehot = jax.nn.one_hot(y[:, 0], C, dtype=jnp.float32, axis=1)
    else:
        y_onehot = y.astype(jnp.float32)
    x = x.astype(jnp.float32)
    tp = jnp.sum(x * y_onehot, axis=(2, 3))
    fp = jnp.sum(x * (1.0 - y_onehot), axis=(2, 3))
    fn = jnp.sum((1.0 - x) * y_onehot, axis=(2, 3))
    dc = (2.0 * tp + SMOOTH) / (2.0 * tp + fp + fn + SMOOTH)
    return 1.0 - jnp.mean(dc)


if __name__ == "__main__":
    key = jax.random.PRNGKey(0)
    kx, ky = jax.random.split(key)
    B, C, H, W = 2, 4, 16, 16
    # net output (no nonlinearity applied, per apply_nonlin=None)
    x = jax.random.uniform(kx, (B, C, H, W), dtype=jnp.float32)
    # integer label map (b, x, y) in [0, C)
    y = jax.random.randint(ky, (B, H, W), 0, C, dtype=jnp.int32)

    out = jax.block_until_ready(soft_dice_loss(x, y))
    ref = jax.block_until_ready(soft_dice_loss_ref(x, y))
    assert jnp.allclose(out, ref, rtol=1e-5, atol=1e-5), (out, ref)
    print("KERNEL_OK")
</pallas_src>

<mosaic_0001>
module attributes {stable_mosaic.version = 11 : i64} {
  func.func @_soft_dice_kernel(%arg0: i32, %arg1: i32, %arg2: memref<1x4x256xf32, #tpu.memory_space<vmem>>, %arg3: memref<1x1x256xi32, #tpu.memory_space<vmem>>, %arg4: memref<1x1x4xf32, #tpu.memory_space<vmem>>, %arg5: memref<1x4x256xf32, #tpu.memory_space<vmem>>, %arg6: memref<1x4x256xf32, #tpu.memory_space<vmem>>) attributes {dimension_semantics = [#tpu.dimension_semantics<parallel>, #tpu.dimension_semantics<arbitrary>], iteration_bounds = array<i64: 2, 1>, scalar_prefetch = 0 : i64, scratch_operands = 2 : i64, tpu.core_type = #tpu.core_type<tc>, window_params = [{transform_indices = @transform_0, window_bounds = array<i64: 1, 4, 256>}, {transform_indices = @transform_1, window_bounds = array<i64: 1, 1, 256>}, {transform_indices = @transform_2, window_bounds = array<i64: 1, 1, 4>}]} {
    %c0_i32 = arith.constant 0 : i32
    %0 = arith.cmpi eq, %arg1, %c0_i32 : i32
    %1 = arith.extui %0 : i1 to i32
    %c0_i32_0 = arith.constant 0 : i32
    %2 = arith.cmpi ne, %1, %c0_i32_0 : i32
    scf.if %2 {
      %cst = arith.constant 0.000000e+00 : f32
      %21 = vector.broadcast %cst : f32 to vector<1x4x256xf32>
      %c0_20 = arith.constant 0 : index
      %c0_21 = arith.constant 0 : index
      %c0_22 = arith.constant 0 : index
      %22 = vector.load %arg5[%c0_20, %c0_21, %c0_22] : memref<1x4x256xf32, #tpu.memory_space<vmem>>, vector<1x4x256xf32>
      tpu.vector_store %arg5[%c0_20, %c0_21, %c0_22], %21 {strides = array<i32>} : memref<1x4x256xf32, #tpu.memory_space<vmem>>, vector<1x4x256xf32>,
      %cst_23 = arith.constant 0.000000e+00 : f32
      %23 = vector.broadcast %cst_23 : f32 to vector<1x4x256xf32>
      %c0_24 = arith.constant 0 : index
      %c0_25 = arith.constant 0 : index
      %c0_26 = arith.constant 0 : index
      %24 = vector.load %arg6[%c0_24, %c0_25, %c0_26] : memref<1x4x256xf32, #tpu.memory_space<vmem>>, vector<1x4x256xf32>
      tpu.vector_store %arg6[%c0_24, %c0_25, %c0_26], %23 {strides = array<i32>} : memref<1x4x256xf32, #tpu.memory_space<vmem>>, vector<1x4x256xf32>,
    } else {
    }
    %c0 = arith.constant 0 : index
    %c0_1 = arith.constant 0 : index
    %c0_2 = arith.constant 0 : index
    %3 = vector.load %arg2[%c0, %c0_1, %c0_2] : memref<1x4x256xf32, #tpu.memory_space<vmem>>, vector<1x4x256xf32>
    %c0_3 = arith.constant 0 : index
    %c0_4 = arith.constant 0 : index
    %c0_5 = arith.constant 0 : index
    %4 = vector.load %arg3[%c0_3, %c0_4, %c0_5] : memref<1x1x256xi32, #tpu.memory_space<vmem>>, vector<1x1x256xi32>
    %5 = tpu.iota {dimensions = array<i32: 1>} : vector<1x4x256xi32>
    %6 = vector.broadcast %4 : vector<1x1x256xi32> to vector<1x4x256xi32>
    %7 = arith.cmpi eq, %5, %6 : vector<1x4x256xi32>
    %8 = arith.extui %7 : vector<1x4x256xi1> to vector<1x4x256xi32>
    %9 = arith.sitofp %8 : vector<1x4x256xi32> to vector<1x4x256xf32>
    %c0_6 = arith.constant 0 : index
    %c0_7 = arith.constant 0 : index
    %c0_8 = arith.constant 0 : index
    %10 = vector.load %arg5[%c0_6, %c0_7, %c0_8] : memref<1x4x256xf32, #tpu.memory_space<vmem>>, vector<1x4x256xf32>
    %11 = arith.mulf %3, %9 : vector<1x4x256xf32>
    %12 = arith.addf %10, %11 : vector<1x4x256xf32>
    %c0_9 = arith.constant 0 : index
    %c0_10 = arith.constant 0 : index
    %c0_11 = arith.constant 0 : index
    %13 = vector.load %arg5[%c0_9, %c0_10, %c0_11] : memref<1x4x256xf32, #tpu.memory_space<vmem>>, vector<1x4x256xf32>
    tpu.vector_store %arg5[%c0_9, %c0_10, %c0_11], %12 {strides = array<i32>} : memref<1x4x256xf32, #tpu.memory_space<vmem>>, vector<1x4x256xf32>,
    %c0_12 = arith.constant 0 : index
    %c0_13 = arith.constant 0 : index
    %c0_14 = arith.constant 0 : index
    %14 = vector.load %arg6[%c0_12, %c0_13, %c0_14] : memref<1x4x256xf32, #tpu.memory_space<vmem>>, vector<1x4x256xf32>
    %15 = arith.addf %3, %9 : vector<1x4x256xf32>
    %16 = arith.addf %14, %15 : vector<1x4x256xf32>
    %c0_15 = arith.constant 0 : index
    %c0_16 = arith.constant 0 : index
    %c0_17 = arith.constant 0 : index
    %17 = vector.load %arg6[%c0_15, %c0_16, %c0_17] : memref<1x4x256xf32, #tpu.memory_space<vmem>>, vector<1x4x256xf32>
    tpu.vector_store %arg6[%c0_15, %c0_16, %c0_17], %16 {strides = array<i32>} : memref<1x4x256xf32, #tpu.memory_space<vmem>>, vector<1x4x256xf32>,
    %c0_i32_18 = arith.constant 0 : i32
    %18 = arith.cmpi eq, %arg1, %c0_i32_18 : i32
    %19 = arith.extui %18 : i1 to i32
    %c0_i32_19 = arith.constant 0 : i32
    %20 = arith.cmpi ne, %19, %c0_i32_19 : i32
    scf.if %20 {
      %c0_20 = arith.constant 0 : index
      %c0_21 = arith.constant 0 : index
      %c0_22 = arith.constant 0 : index
      %21 = vector.load %arg5[%c0_20, %c0_21, %c0_22] : memref<1x4x256xf32, #tpu.memory_space<vmem>>, vector<1x4x256xf32>
      %cst = arith.constant dense<0.000000e+00> : vector<1x4xf32>
      %22 = vector.multi_reduction <add>, %21, %cst [2] : vector<1x4x256xf32> to vector<1x4xf32>
      %c0_23 = arith.constant 0 : index
      %c0_24 = arith.constant 0 : index
      %c0_25 = arith.constant 0 : index
      %23 = vector.load %arg6[%c0_23, %c0_24, %c0_25] : memref<1x4x256xf32, #tpu.memory_space<vmem>>, vector<1x4x256xf32>
      %cst_26 = arith.constant dense<0.000000e+00> : vector<1x4xf32>
      %24 = vector.multi_reduction <add>, %23, %cst_26 [2] : vector<1x4x256xf32> to vector<1x4xf32>
      %cst_27 = arith.constant 2.000000e+00 : f32
      %25 = vector.broadcast %cst_27 : f32 to vector<1x4xf32>
      %26 = arith.mulf %25, %22 : vector<1x4xf32>
      %cst_28 = arith.constant 1.000000e+00 : f32
      %27 = vector.broadcast %cst_28 : f32 to vector<1x4xf32>
      %28 = arith.addf %26, %27 : vector<1x4xf32>
      %cst_29 = arith.constant 1.000000e+00 : f32
      %29 = vector.broadcast %cst_29 : f32 to vector<1x4xf32>
      %30 = arith.addf %24, %29 : vector<1x4xf32>
      %31 = arith.divf %28, %30 : vector<1x4xf32>
      %32 = vector.shape_cast %31 : vector<1x4xf32> to vector<1x1x4xf32>
      %c0_30 = arith.constant 0 : index
      %c0_31 = arith.constant 0 : index
      %c0_32 = arith.constant 0 : index
      %33 = vector.load %arg4[%c0_30, %c0_31, %c0_32] : memref<1x1x4xf32, #tpu.memory_space<vmem>>, vector<1x1x4xf32>
      tpu.vector_store %arg4[%c0_30, %c0_31, %c0_32], %32 {strides = array<i32>} : memref<1x1x4xf32, #tpu.memory_space<vmem>>, vector<1x1x4xf32>,
    } else {
    }
    return
  }
  func.func @transform_0(%arg0: i32, %arg1: i32) -> (i32, i32, i32) {
    %c0_i32 = arith.constant 0 : i32
    %c0_i32_0 = arith.constant 0 : i32
    return %arg0, %c0_i32, %arg1 : i32, i32, i32
  }
  func.func @transform_1(%arg0: i32, %arg1: i32) -> (i32, i32, i32) {
    %c0_i32 = arith.constant 0 : i32
    %c0_i32_0 = arith.constant 0 : i32
    return %arg0, %c0_i32, %arg1 : i32, i32, i32
  }
  func.func @transform_2(%arg0: i32, %arg1: i32) -> (i32, i32, i32) {
    %c0_i32 = arith.constant 0 : i32
    %c0_i32_0 = arith.constant 0 : i32
    %c0_i32_1 = arith.constant 0 : i32
    return %arg0, %c0_i32, %c0_i32_0 : i32, i32, i32
  }
}

</mosaic_0001>

<bundles_post_ra>
// kernel: tpu_custom_call.1
= control target key start
LH: loop header
LB: loop body
LE: loop exit
PB: predicated region body
PF: predicated region fallthrough
CT: control target
= control target key end

     0   :  { %7 = vsyncpa [#allocation5], 0  ;;  %s881_s0 = inlined_call_operand.hbm [shape: f32[2,4,256], index: 0, kind: input, shape index: {}]   ;;  %s882_s1 = inlined_call_operand.hbm [shape: s32[2,1,256], index: 1, kind: input, shape index: {}]   ;;  %s883_s2 = inlined_call_operand.hbm [shape: f32[2,1,4], index: 2, kind: output, shape index: {}]  }
   0x1   :  { %9 = vsyncpa [#allocation5 + $0x1], 0 }
   0x2   :  { %10 = vsyncpa [#allocation8], 0 }
   0x3   :  { %12 = vsyncpa [#allocation8 + $0x1], 0 }
   0x4   :  { %13 = vsyncpa [#allocation6], 0 }
   0x5   :  { %15 = vsyncpa [#allocation6 + $0x1], 0  ;;  %s665_s9 = smov 0   ;;  %s667_s10 = smov 0  }
   0x6   :  { %s669_s11 = smov 0   ;;  %s671_s12 = smov 0  }
   0x7   :  { %s673_s13 = smov 0   ;;  %s675_s14 = smov 0  }
   0x8 LB: > { %s408_s15 = sadd.s32 4294967295, %s644_s14   ;;  %s409_s16 = sadd.s32 4294967294, %s644_s14   ;;  %s644_s14 = sphi %s675_s14, %s21_s14   ;;  %s640_s13 = sphi %s673_s13, %s903_s13   ;;  %s636_s12 = sphi %s671_s12, %s902_s12   ;;  %s632_s11 = sphi %s669_s11, %s901_s11   ;;  %s628_s10 = sphi %s667_s10, %s900_s10   ;;  %s624_s9 = sphi %s665_s9, %s899_s9  }
   0x9   : > { %s33_s17 = sadd.s32 1, %s640_s13  ;;  %s42_s18 = sadd.s32 1, %s632_s11 }
   0xa   : > { %p35_p0 = scmp.ge.s32.totalorder %s33_s17, 2  ;;  %p49_p1 = scmp.ne.s32.totalorder %s632_s11, %s628_s10 }
   0xb   : > { %p50_p2 = scmp.eq.s32.totalorder %s644_s14, 0  ;;  %p55_p3 = scmp.ne.s32.totalorder %s628_s10, %s624_s9 }
   0xc   : > { %s905_s17 = smov (%p35_p0, %s33_s17), 0  ;;  %p56_p5 = scmp.eq.s32.totalorder %s408_s15, 0 }
   0xd   : > { %p706_p4 = por %p50_p2, %p49_p1  ;;  %s37_s20 = ssub.s32 %s640_s13, %s905_s17 }
   0xe   : > { %p107_p6 = scmp.eq.s32.totalorder %s408_s15, 1  ;;  %p40_p7 = scmp.eq.s32.totalorder %s37_s20, 0 }
   0xf   : > { %p712_p8 = por %p56_p5, %p55_p3  ;;  %p113_p10 = scmp.eq.s32.totalorder %s409_s16, 1 }
  0x10   : > { %p716_p9 = por %p107_p6, %p49_p1  ;;  %p445_p13 = scmp.lt.s32.totalorder %s644_s14, 2 }
  0x11   : > { %s887_s21 = scalar_select %p712_p8, 1, 0 }
  0x12   : > { %s888_s22 = scalar_select %p716_p9, 1, 0 }
  0x13   : > { %s721_s23 = scalar_select %p40_p7, %s632_s11, %s42_s18  }
  0x14   : > { %p723_p11 = por %p113_p10, %p55_p3  ;;  %s730_s25 = sand.u32 1, %s632_s11  }
  0x15   : > { %s412_s26 = sshll.u32 %s730_s25, 3  ;;  %s426_s27 = sshll.u32 %s640_s13, 7 }
  0x16   : > { %s889_s24 = scalar_select %p723_p11, 1, 0 }
  0x17   : > { %s737_s30 = scalar_lea.hbm %s881_s0, %s426_s27  ;;  %s137_s3 = scalar_lea.vmem [#allocation4], %s412_s26 }
  0x18   : > { %s147_s4 = sshll.u32 %s137_s3, 4  ;;  %p743_p0 = pnand %p445_p13, %p706_p4  ;;  %s739_s4 = int_to_ptr.vmem [resolvable:$true] %s147_s4 }
  0x19   : > { %s134_s6 = scalar_lea.sflag [#allocation5], %s730_s25  ;;  %s498_s7 = scalar_lea.hbm %s737_s30, 128 }
  0x1a   : > { %p499_p3 = scmp.ne.s32.totalorder %s737_s30, %s498_s7  ;;  %p500_p5 = pneg %p743_p0 }
  0x1b   : > { %s503_s16 = scalar_lea.hbm %s881_s0, 256  ;;  %p504_p4 = scmp.lt.u32.totalorder %s737_s30, %s881_s0 }
  0x1c   : > { %p501_p6 = pnand %p500_p5, %p499_p3  ;;  %p505_p10 = scmp.lt.u32.totalorder %s503_s16, %s498_s7 }
  0x1d   : > { %p507_p12 = scmp.lt.u32.totalorder %s498_s7, %s737_s30 }
  0x1e   : > { %p502_p7 = pneg %p501_p6  ;;  %p506_p13 = por %p505_p10, %p504_p4 }
  0x20   : > { %p508_p1 = por %p507_p12, %p506_p13 }
  0x22   : > { %p509_p2 = pnand %p508_p1, %p502_p7 }
  0x24   : > { %512 = shalt.err (!%p509_p2)
}
  0x25   : > { %s513_s20 = scalar_lea.vmem %s739_s4, 128  ;;  %s646_s26 = smov [#allocation4]  }
  0x26   : > { %p514_p3 = scmp.ne.s32.totalorder %s739_s4, %s513_s20  ;;  %s518_s27 = sshll.u32 %s646_s26, 4  ;;  %s519_s27 = int_to_ptr.vmem [resolvable:$false] %s518_s27 }
  0x27   : > { %s520_s28 = scalar_lea.vmem %s519_s27, 256  ;;  %p521_p9 = scmp.lt.s32.totalorder %s739_s4, %s519_s27 }
  0x28   : > { %p516_p6 = pnand %p514_p3, %p500_p5  ;;  %p522_p4 = scmp.lt.s32.totalorder %s520_s28, %s513_s20 }
  0x2a   : > { %p517_p11 = pneg %p516_p6  ;;  %p523_p10 = por %p522_p4, %p521_p9 }
  0x2c   : > { %p524_p12 = pnand %p523_p10, %p517_p11 }
  0x2e   : > { %527 = shalt.err (!%p524_p12)
}
  0x2f   : > { %437 = dma.hbm_to_vmem [thread:$0]  (!%p743_p0), %s737_s30, 128, %s739_s4, %s134_s6  }
  0x30   : > { %p891_p1 = scmp.lt.s32.totalorder %s644_s14, 3  ;;  %p892_p2 = scmp.ge.s32.totalorder %s644_s14, 1 }
  0x31   : > { %s415_s3 = sshll.u32 %s730_s25, 1  ;;  %s427_s7 = sshll.u32 %s640_s13, 5 }
  0x32   : > { %p779_p7 = pnand %p892_p2, %p891_p1  ;;  %s788_s16 = scalar_lea.hbm %s882_s1, %s427_s7 }
  0x33   : > { %s158_s18 = scalar_lea.vmem [#allocation7], %s415_s3  ;;  %s155_s30 = scalar_lea.sflag [#allocation8], %s730_s25 }
  0x34   : > { %s893_s29 = scalar_select %p779_p7, 1, 0 }
  0x35   : > { %s168_s19 = sshll.u32 %s158_s18, 4  ;;  %s528_s4 = scalar_lea.hbm %s788_s16, 32  ;;  %s169_s19 = int_to_ptr.vmem [resolvable:$true] %s168_s19 }
  0x36   : > { %p529_p9 = scmp.ne.s32.totalorder %s788_s16, %s528_s4  ;;  %s533_s26 = scalar_lea.hbm %s882_s1, 64 }
  0x37   : > { %p534_p3 = scmp.lt.u32.totalorder %s788_s16, %s882_s1  ;;  %p535_p6 = scmp.lt.u32.totalorder %s533_s26, %s528_s4 }
  0x38   : > { %p531_p11 = pnand %p529_p9, %p500_p5  ;;  %p537_p10 = scmp.lt.u32.totalorder %s528_s4, %s788_s16 }
  0x39   : > { %p536_p4 = por %p535_p6, %p534_p3 }
  0x3a   : > { %p532_p13 = pneg %p531_p11 }
  0x3b   : > { %p538_p12 = por %p537_p10, %p536_p4 }
  0x3d   : > { %p539_p1 = pnand %p538_p12, %p532_p13 }
  0x3f   : > { %542 = shalt.err (!%p539_p1)
}
  0x40   : > { %s543_s25 = scalar_lea.vmem %s169_s19, 32  ;;  %s647_s3 = smov [#allocation7]  }
  0x41   : > { %p544_p2 = scmp.ne.s32.totalorder %s169_s19, %s543_s25  ;;  %s548_s7 = sshll.u32 %s647_s3, 4  ;;  %s549_s7 = int_to_ptr.vmem [resolvable:$false] %s548_s7 }
  0x42   : > { %s550_s8 = scalar_lea.vmem %s549_s7, 64  ;;  %p551_p8 = scmp.lt.s32.totalorder %s169_s19, %s549_s7 }
  0x43   : > { %p546_p9 = pnand %p544_p2, %p500_p5  ;;  %p552_p7 = scmp.lt.s32.totalorder %s550_s8, %s543_s25 }
  0x45   : > { %p547_p11 = pneg %p546_p9  ;;  %p553_p3 = por %p552_p7, %p551_p8 }
  0x47   : > { %p554_p6 = pnand %p553_p3, %p547_p11 }
  0x49   : > { %557 = shalt.err (!%p554_p6)
}
  0x4a   : > { %440 = dma.hbm_to_vmem [thread:$0]  (!%p743_p0), %s788_s16, 32, %s169_s19, %s155_s30  }
  0x4b   : > { %p894_p13 = scmp.ne.s32.totalorder %s893_s29, 0 }
  0x4c   : > { %s813_s15 = sand.u32 (!%p894_p13), 1, %s628_s10   ;;  %p895_p5 = scmp.ne.s32.totalorder (!%p894_p13), %s887_s21, 0 }
  0x4d   : > { %177 = sbr.rel (%p894_p13) target bundleno = 280 (0x118), region = 28  ;;  %s419_s18 = sshll.u32 (!%p894_p13), %s813_s15, 3 }
  0x4e   : > { %s180_s4 = scalar_lea.sflag (!%p894_p13), [#allocation5], %s813_s15  ;;  %s183_s6 = scalar_lea.vmem (!%p894_p13), [#allocation4], %s419_s18 }
  0x54   : > { %611 = dma.done.wait (%p895_p5), %s180_s4, 128  }
  0x55   : > { %613 = vsyncadd (%p895_p5), %s180_s4, 4294967168  ;;  %s420_s5 = sshll.u32 %s813_s15, 1  ;;  %s189_s29 = scalar_lea.sflag [#allocation8], %s813_s15 }
  0x56   : > { %s192_s16 = scalar_lea.vmem [#allocation7], %s420_s5 }
  0x57   : > { %615 = dma.done.wait (%p895_p5), %s189_s29, 32  }
  0x58   : > { %617 = vsyncadd (%p895_p5), %s189_s29, 4294967264  ;;  %v227_v0 = vlaneseq  ;;  %v226_v4 = vld [vmem:[%s192_s16] sm:$0x3]  ;;  %v225_v7 = vld [vmem:[%s183_s6] sm:$0xff]  ;;  %v648_v8 = vmov 0.0   ;;  %vm262_vm2 = vcmask 1043456  }
  0x59   : > { %s423_s21 = sshll.u32 %s636_s12, 4  ;;  %s216_s19 = scalar_lea.vmem [#allocation9], %s813_s15  ;;  %vm290_vm3 = vcmask 24576  }
  0x5a   : > { %v228_v1 = vshrl.u32 %v227_v0, 7  ;;  %v284_v22 = vand.u32 127, %v227_v0  ;;  %s305_s30 = sshll.u32 %s216_s19, 4  ;;  %s832_s27 = scalar_lea.hbm %s883_s2, %s423_s21  ;;  %s834_s30 = int_to_ptr.vmem [resolvable:$true] %s305_s30 }
  0x5b   : > { %s293_s28 = scalar_lea.sflag [#allocation6], %s813_s15  ;;  %s558_s25 = scalar_lea.vmem %s834_s30, 16 }
  0x5c   : > { %v231_v2 = vsub.s32 0, %v228_v1  ;;  %v235_v3 = vsub.s32 1, %v228_v1  ;;  %v287_v23 = vsub.s32 %v284_v22, %v228_v1  ;;  %p559_p8 = scmp.ne.s32.totalorder %s834_s30, %s558_s25  ;;  %p896_p0 = scmp.ne.s32.totalorder %s888_s22, 0 }
  0x5d   : > { %s649_s12 = smov [#allocation9]  }
  0x5e   : > { %v232_v5 = vrot.slane %v226_v4, %v231_v2  ;;  %v236_v6 = vrot.slane %v226_v4, %v235_v3  ;;  %p560_p7 = pnand %p559_p8, %p896_p0  ;;  %s562_s3 = sshll.u32 %s649_s12, 4  ;;  %s563_s3 = int_to_ptr.vmem [resolvable:$false] %s562_s3 }
  0x5f   : > { %s564_s7 = scalar_lea.vmem %s563_s3, 32  ;;  %p565_p10 = scmp.lt.s32.totalorder %s834_s30, %s563_s3 }
  0x60   : > { %vm237_vm0 = vcmp.eq.s32.totalorder %v228_v1, %v232_v5  ;;  %vm238_vm1 = vcmp.eq.s32.totalorder %v228_v1, %v236_v6  ;;  %p561_p4 = pneg %p560_p7  ;;  %p566_p12 = scmp.lt.s32.totalorder %s564_s7, %s558_s25 }
  0x61   : > { %v421_v9 = vsel %vm237_vm0, 1.0, %v648_v8  ;;  %v422_v10 = vsel %vm238_vm1, 1.0, %v648_v8 }
  0x62   : > { %v246_v11 = vcombine.low %v421_v9, %v422_v10  ;;  %p567_p1 = por %p566_p12, %p565_p10 }
  0x64   : > { %v252_v12 = vadd.f32 %v246_v11, %v225_v7  ;;  %v248_v13 = vmul.f32 %v246_v11, %v225_v7  ;;  %p568_p2 = pnand %p567_p1, %p561_p4 }
  0x66   : > { %v270_v14 = vcombine.high %v252_v12, %v252_v12  ;;  %v272_v15 = vsel %vm262_vm2, %v252_v12, 0.0  ;;  %v260_v16 = vcombine.high %v248_v13, %v248_v13  ;;  %v263_v18 = vsel %vm262_vm2, %v248_v13, 0.0 }
  0x68   : > { %v273_v17 = vsel %vm262_vm2, %v270_v14, 0.0  ;;  %v264_v19 = vsel %vm262_vm2, %v260_v16, 0.0 }
  0x69   : > { %v274_v20 = vadd.f32 %v273_v17, %v272_v15  ;;  %v265_v21 = vadd.f32 %v264_v19, %v263_v18 }
  0x6b   : > { %275 = vadd.xlane.f32.xlu0 %v274_v20 }
  0x6f   : > { %266 = vadd.xlane.f32.xlu0 %v265_v21 }
  0xf8   : > { %v276_v24 = vpop.xlane.xlu0 %275 }
  0xf9   : > { %v279_v25 = vadd.f32 1.0, %v276_v24 }
  0xfb   : > { %496 = vrcp.f32 %v279_v25 }
  0xfc   : > { %v267_v26 = vpop.xlane.xlu0 %266 }
  0xfd   : > { %v277_v27 = vmul.f32 2.0, %v267_v26 }
  0xff   : > { %v278_v28 = vadd.f32 1.0, %v277_v27 }
 0x105   : > { %v497_v29 = vpop.eup %496 }
 0x106   : > { %v281_v30 = vmul.f32 %v497_v29, %v278_v28 }
 0x108   : > { %v288_v31 = vrot.slane %v281_v30, %v287_v23 }
 0x10a   : > { %291 = vst.msk [vmem:[%s216_s19] sm:$0x1] %vm290_vm3, %v288_v31 }
 0x10b   : > { %571 = shalt.err (!%p568_p2)
}
 0x10c   : > { %s572_s8 = scalar_lea.hbm %s832_s27, 16  ;;  %s576_s4 = scalar_lea.hbm %s883_s2, 32 }
 0x10d   : > { %p573_p9 = scmp.ne.s32.totalorder %s832_s27, %s572_s8  ;;  %p577_p6 = scmp.lt.u32.totalorder %s832_s27, %s883_s2 }
 0x10e   : > { %p578_p13 = scmp.lt.u32.totalorder %s576_s4, %s572_s8  ;;  %p580_p8 = scmp.lt.u32.totalorder %s572_s8, %s832_s27 }
 0x10f   : > { %p574_p11 = pnand %p573_p9, %p896_p0 }
 0x110   : > { %p579_p5 = por %p578_p13, %p577_p6 }
 0x111   : > { %p575_p3 = pneg %p574_p11 }
 0x112   : > { %p581_p7 = por %p580_p8, %p579_p5 }
 0x114   : > { %p582_p4 = pnand %p581_p7, %p575_p3 }
 0x116   : > { %585 = shalt.err (!%p582_p4)
}
 0x117   : > { %432 = dma.vmem_to_hbm [thread:$0]  (%p896_p0), %s834_s30, 16, %s832_s27, %s293_s28  }
 0x118 PF: > { %s317_s29 = sand.u32 1, %s624_s9   ;;  %p897_p10 = scmp.ne.s32.totalorder %s889_s24, 0 }
 0x119   : > { %p898_p12 = scmp.ge.s32.totalorder %s644_s14, 2  ;;  %s318_s16 = scalar_lea.sflag [#allocation6], %s317_s29 }
 0x11b   : > { %p442_p1 = pnand %p898_p12, %p897_p10 }
 0x11d   : > { %619 = dma.done.wait (!%p442_p1), %s318_s16, 16  }
 0x11e   : > { %621 = vsyncadd (!%p442_p1), %s318_s16, 4294967280  ;;  %s21_s14 = sadd.s32 1, %s644_s14   ;;  %s899_s9 = smov %s628_s10 }
 0x11f   : > { %p18_p2 = scmp.ge.s32.totalorder %s21_s14, 4   ;;  %s900_s10 = smov %s632_s11 }
 0x120   : > { %s901_s11 = smov %s721_s23  ;;  %s902_s12 = smov %s640_s13 }
 0x121   : > { %s903_s13 = smov %s905_s17  ;;  %20 = sbr.rel (!%p18_p2) target bundleno = 8 (0x8), region = 94 }
 0x128   :  { %322 = vsyncpa [#allocation5], 1 }
 0x129   :  { %324 = vsyncpa [#allocation5 + $0x1], 1 }
 0x12a   :  { %325 = vsyncpa [#allocation8], 1 }
 0x12b   :  { %327 = vsyncpa [#allocation8 + $0x1], 1 }
 0x12c   :  { %328 = vsyncpa [#allocation6], 1 }
 0x12d   :  { %330 = vsyncpa [#allocation6 + $0x1], 1 }

</bundles_post_ra>
